<compile_context>
chip_gen: v5e
topology: v5e:2x2
jax: 0.10.0
libtpu: 0.0.40
codegen_flags: <defaults>
</compile_context>

<pallas_src>
import jax
import jax.numpy as jnp
from jax.experimental import pallas as pl
from jax.experimental.pallas import tpu as pltpu


def _round_up(x, m):
    return ((x + m - 1) // m) * m


def _disc_kernel(xa_ref, xc_ref, wa_ref, wc_ref, b1_ref, w2_ref, b2_ref, out_ref):
    # xa_ref: (TB, d_adj)  activations      wa_ref: (d_adj,  Hp) bf16
    # xc_ref: (TB, d_cond) activations      wc_ref: (d_cond, Hp) bf16
    # b1_ref: (1, Hp) f32                   w2_ref: (1, Hp) f32 (fc2 weight row)
    # b2_ref: (1,) f32 in SMEM              out_ref: (1, TB) f32 (lane-dense)
    xa = xa_ref[...].astype(jnp.bfloat16)
    xc = xc_ref[...].astype(jnp.bfloat16)

    # fc1 as a split matmul (no concat anywhere): MXU, f32 accumulation.
    h = jnp.dot(xa, wa_ref[...], preferred_element_type=jnp.float32)
    h = h + jnp.dot(xc, wc_ref[...], preferred_element_type=jnp.float32)
    h = jnp.maximum(h + b1_ref[...], 0.0)  # bias + ReLU in f32 (VPU)

    # fc2 (H -> 1): VPU multiply + lane reduction; padded H columns of w2 are 0.
    y = jnp.sum(h * w2_ref[...], axis=-1, keepdims=True) + b2_ref[0]  # (TB, 1)
    # Lane-dense store: (TB, 1) -> (1, TB); the tiny transpose uses the XLU slot.
    out_ref[...] = jnp.transpose(y).astype(out_ref.dtype)


# Whether this jax/Mosaic build accepts single-buffered resident weights
# (pipeline_mode=pl.Buffered(1)); resolved on the first call and cached.
_SINGLE_BUFFER_OK = None


def discriminator_forward(adj_matrix, cond, params, *, block_b=512):
    """Pallas forward of Discriminator(adj_matrix, cond) -> (B, 1) float32.

    adj_matrix: (B, ...) flattened to (B, d_adj); cond: (B, d_cond). Feed
    activations in bf16 from the producer when possible (halves the dominant
    HBM stream); f32 is also accepted and cast in-VMEM.
    """
    assert block_b % 128 == 0
    B = adj_matrix.shape[0]
    x_adj = adj_matrix.reshape(B, -1)                 # nn.Flatten()
    d_adj = x_adj.shape[1]
    d_cond = cond.shape[1]
    hp = params["w1_adj"].shape[1]
    assert params["w1_adj"].shape[0] == d_adj
    assert params["w1_cond"].shape[0] == d_cond

    # Resident-weight budget guard (bf16 fc1 weights, worst case double-buffered).
    if 2 * (d_adj + d_cond) * hp * 2 > (48 << 20):
        # TODO(synk): add a K-tiled fallback (extra "arbitrary" grid axis over
        # d_adj with an f32 accumulator + pl.when init/finalize) for weights
        # too large to stay VMEM-resident (hit first on v7x's 64 MiB VMEM).
        raise NotImplementedError("fc1 weights too large to stay VMEM-resident")

    # Batch tiling:
    #  * tiny batches: one full-batch block (no padding waste).
    #  * otherwise: tb is a multiple of 128 (lane-dense output tiles), capped
    #    at block_b, and chosen so g >= 2 (v7x megacore gets both TCs busy);
    #    large tb amortizes the ~0.35 us/step pipeline overhead.
    if B < 256:
        tb, g = B, 1
    else:
        tb = min(block_b, max(128, (_round_up(B, 128) // 2) // 128 * 128))
        g = pl.cdiv(B, tb)
    bp = g * tb
    if bp != B:
        x_adj = jnp.pad(x_adj, ((0, bp - B), (0, 0)))
        cond = jnp.pad(cond, ((0, bp - B), (0, 0)))

    # Scoped-VMEM budget: activation tiles (2 bufs) + resident weights + f32
    # hidden intermediate, with 2x headroom; clamped to a per-chip-safe cap.
    act_bytes = jnp.dtype(x_adj.dtype).itemsize
    vmem_est = (
        2 * tb * (d_adj + d_cond) * act_bytes   # activation tiles (double-buffered)
        + 2 * (d_adj + d_cond) * hp * 2         # fc1 weights (bf16), worst case 2 bufs
        + 2 * 2 * hp * 4                        # b1 + w2 rows (f32)
        + 2 * tb * 4                            # (1, tb) f32 output tiles
        + 2 * tb * hp * 4                       # f32 hidden activation + slack
    )
    vmem_limit = int(min(max(2 * vmem_est, 32 << 20), 56 << 20))

    def run(single_buffer_weights):
        def w_spec(shape):
            if single_buffer_weights:
                # Constant index_map -> fetched from HBM once; one buffer
                # halves resident-weight VMEM (matters most on v7x's 64 MiB).
                return pl.BlockSpec(shape, lambda i: (0, 0),
                                    pipeline_mode=pl.Buffered(1))
            return pl.BlockSpec(shape, lambda i: (0, 0))

        return pl.pallas_call(
            _disc_kernel,
            out_shape=jax.ShapeDtypeStruct((1, bp), jnp.float32),
            grid=(g,),
            in_specs=[
                pl.BlockSpec((tb, d_adj), lambda i: (i, 0)),    # adj activations
                pl.BlockSpec((tb, d_cond), lambda i: (i, 0)),   # cond activations
                w_spec((d_adj, hp)),                            # w1_adj (resident)
                w_spec((d_cond, hp)),                           # w1_cond (resident)
                w_spec((1, hp)),                                # b1 (resident)
                w_spec((1, hp)),                                # w2 row (resident)
                pl.BlockSpec(memory_space=pltpu.MemorySpace.SMEM),  # b2 scalar
            ],
            out_specs=pl.BlockSpec((1, tb), lambda i: (0, i)),  # lane-dense output
            compiler_params=pltpu.CompilerParams(
                dimension_semantics=("parallel",),
                vmem_limit_bytes=vmem_limit),
        )(x_adj, cond, params["w1_adj"], params["w1_cond"],
          params["b1"], params["w2"], params["b2"])

    global _SINGLE_BUFFER_OK
    if _SINGLE_BUFFER_OK is None:
        try:
            out = run(True)
            _SINGLE_BUFFER_OK = True
        except Exception:
            _SINGLE_BUFFER_OK = False
            out = run(False)
    else:
        out = run(_SINGLE_BUFFER_OK)

    # (1, bp) lane-dense -> (B, 1) module output.
    return out.reshape(bp, 1)[:B]


def init_params(key, input_dim, cond_dim, hidden_dim, dtype=jnp.float32):
    """PyTorch-style U(+-1/sqrt(fan_in)) init, stored kernel-ready:
    fc1 weight split at the adj/cond boundary, hidden dim zero-padded to a
    multiple of 128, fc1 weights in bf16, fc2 weight as a (1, Hp) f32 row,
    b2 as a 1-D (1,) f32 scalar (lives in SMEM inside the kernel)."""
    k1, k2, k3, k4 = jax.random.split(key, 4)
    d_in1 = input_dim + cond_dim
    bound1 = 1.0 / (d_in1 ** 0.5)
    bound2 = 1.0 / (hidden_dim ** 0.5)
    hp = _round_up(hidden_dim, 128)

    w1 = jax.random.uniform(k1, (d_in1, hidden_dim), dtype, -bound1, bound1)
    b1 = jax.random.uniform(k2, (1, hidden_dim), dtype, -bound1, bound1)
    w2 = jax.random.uniform(k3, (hidden_dim, 1), dtype, -bound2, bound2)
    b2 = jax.random.uniform(k4, (1,), dtype, -bound2, bound2)

    w1_p = jnp.zeros((d_in1, hp), dtype).at[:, :hidden_dim].set(w1)
    b1_p = jnp.zeros((1, hp), dtype).at[:, :hidden_dim].set(b1)
    w2_p = jnp.zeros((1, hp), dtype).at[:, :hidden_dim].set(w2[:, 0][None, :])

    return {
        "w1_adj": w1_p[:input_dim].astype(jnp.bfloat16),
        "w1_cond": w1_p[input_dim:].astype(jnp.bfloat16),
        "b1": b1_p,          # (1, Hp) f32
        "w2": w2_p,          # (1, Hp) f32
        "b2": b2,            # (1,)    f32 -> SMEM scalar
    }


def _reference(adj_matrix, cond, params):
    """Pure-JAX reference using the same bf16-input / f32-accumulate math."""
    B = adj_matrix.shape[0]
    x = jnp.concatenate([adj_matrix.reshape(B, -1).astype(jnp.bfloat16),
                         cond.astype(jnp.bfloat16)], axis=1)
    w1 = jnp.concatenate([params["w1_adj"], params["w1_cond"]], axis=0)
    h = jnp.dot(x, w1, preferred_element_type=jnp.float32) + params["b1"]
    h = jnp.maximum(h, 0.0)
    return jnp.sum(h * params["w2"], axis=-1, keepdims=True) + params["b2"][0]


if __name__ == "__main__":
    # batch=2, adj_matrix 8x8 -> input_dim=64, cond_dim=8, hidden_dim=32
    B, N, COND, HID = 2, 8, 8, 32
    input_dim = N * N

    key = jax.random.PRNGKey(0)
    k_adj, k_cond, k_params, k_adj2, k_cond2 = jax.random.split(key, 5)
    params = init_params(k_params, input_dim, COND, HID)

    # Small-batch path (single block). Activations are produced in bf16
    # upstream (no standalone cast pass inside the forward wrapper).
    adj = jax.random.uniform(k_adj, (B, N, N), jnp.float32).astype(jnp.bfloat16)
    cond = jax.random.normal(k_cond, (B, COND), jnp.float32).astype(jnp.bfloat16)
    out = jax.block_until_ready(discriminator_forward(adj, cond, params))
    ref = _reference(adj, cond, params)
    assert out.shape == (B, 1), out.shape
    assert jnp.allclose(out, ref, atol=2e-3, rtol=2e-3), "mismatch vs reference (small B)"

    # Tiled path: >=2 batch tiles ("parallel" axis -> both v7x TCs busy),
    # VMEM-resident weights, lane-dense (1, TB) output blocks.
    B2 = 256
    adj2 = jax.random.uniform(k_adj2, (B2, N, N), jnp.float32).astype(jnp.bfloat16)
    cond2 = jax.random.normal(k_cond2, (B2, COND), jnp.float32).astype(jnp.bfloat16)
    out2 = jax.block_until_ready(discriminator_forward(adj2, cond2, params))
    ref2 = _reference(adj2, cond2, params)
    assert out2.shape == (B2, 1), out2.shape
    assert jnp.allclose(out2, ref2, atol=2e-3, rtol=2e-3), "mismatch vs reference (tiled B)"

    print("KERNEL_OK")
</pallas_src>

<mosaic_0001>
module attributes {stable_mosaic.version = 11 : i64} {
  func.func @_disc_kernel(%arg0: i32, %arg1: memref<2x64xbf16, #tpu.memory_space<vmem>>, %arg2: memref<2x8xbf16, #tpu.memory_space<vmem>>, %arg3: memref<64x128xbf16, #tpu.memory_space<vmem>>, %arg4: memref<8x128xbf16, #tpu.memory_space<vmem>>, %arg5: memref<1x128xf32, #tpu.memory_space<vmem>>, %arg6: memref<1x128xf32, #tpu.memory_space<vmem>>, %arg7: memref<1xf32, #tpu.memory_space<smem>>, %arg8: memref<1x2xf32, #tpu.memory_space<vmem>>) attributes {dimension_semantics = [#tpu.dimension_semantics<parallel>], iteration_bounds = array<i64: 1>, scalar_prefetch = 0 : i64, scratch_operands = 0 : i64, tpu.core_type = #tpu.core_type<tc>, window_params = [{transform_indices = @transform_0, window_bounds = array<i64: 2, 64>}, {transform_indices = @transform_1, window_bounds = array<i64: 2, 8>}, {pipeline_mode = #tpu.pipeline_mode<synchronous>, transform_indices = @transform_2, window_bounds = array<i64: 64, 128>}, {pipeline_mode = #tpu.pipeline_mode<synchronous>, transform_indices = @transform_3, window_bounds = array<i64: 8, 128>}, {pipeline_mode = #tpu.pipeline_mode<synchronous>, transform_indices = @transform_4, window_bounds = array<i64: 1, 128>}, {pipeline_mode = #tpu.pipeline_mode<synchronous>, transform_indices = @transform_5, window_bounds = array<i64: 1, 128>}, {transform_indices = @transform_6, window_bounds = array<i64: 1>}, {transform_indices = @transform_7, window_bounds = array<i64: 1, 2>}]} {
    %c0 = arith.constant 0 : index
    %c0_0 = arith.constant 0 : index
    %0 = vector.load %arg1[%c0, %c0_0] : memref<2x64xbf16, #tpu.memory_space<vmem>>, vector<2x64xbf16>
    %c0_1 = arith.constant 0 : index
    %c0_2 = arith.constant 0 : index
    %1 = vector.load %arg2[%c0_1, %c0_2] : memref<2x8xbf16, #tpu.memory_space<vmem>>, vector<2x8xbf16>
    %c0_3 = arith.constant 0 : index
    %c0_4 = arith.constant 0 : index
    %2 = vector.load %arg3[%c0_3, %c0_4] : memref<64x128xbf16, #tpu.memory_space<vmem>>, vector<64x128xbf16>
    %cst = arith.constant dense<0.000000e+00> : vector<2x128xf32>
    %3 = tpu.matmul %0, %2, %cst {dimension_numbers = #tpu.dot_dimension_numbers<[1], [0], [0], [1], [0, 0, 1, 1], [], []>} : vector<2x64xbf16>, vector<64x128xbf16>, vector<2x128xf32> -> vector<2x128xf32>
    %c0_5 = arith.constant 0 : index
    %c0_6 = arith.constant 0 : index
    %4 = vector.load %arg4[%c0_5, %c0_6] : memref<8x128xbf16, #tpu.memory_space<vmem>>, vector<8x128xbf16>
    %cst_7 = arith.constant dense<0.000000e+00> : vector<2x128xf32>
    %5 = tpu.matmul %1, %4, %cst_7 {dimension_numbers = #tpu.dot_dimension_numbers<[1], [0], [0], [1], [0, 0, 1, 1], [], []>} : vector<2x8xbf16>, vector<8x128xbf16>, vector<2x128xf32> -> vector<2x128xf32>
    %6 = arith.addf %3, %5 : vector<2x128xf32>
    %c0_8 = arith.constant 0 : index
    %c0_9 = arith.constant 0 : index
    %7 = vector.load %arg5[%c0_8, %c0_9] : memref<1x128xf32, #tpu.memory_space<vmem>>, vector<1x128xf32>
    %8 = vector.broadcast %7 : vector<1x128xf32> to vector<2x128xf32>
    %9 = arith.addf %6, %8 : vector<2x128xf32>
    %cst_10 = arith.constant 0.000000e+00 : f32
    %10 = vector.broadcast %cst_10 : f32 to vector<2x128xf32>
    %11 = arith.maximumf %9, %10 : vector<2x128xf32>
    %c0_11 = arith.constant 0 : index
    %c0_12 = arith.constant 0 : index
    %12 = vector.load %arg6[%c0_11, %c0_12] : memref<1x128xf32, #tpu.memory_space<vmem>>, vector<1x128xf32>
    %13 = vector.broadcast %12 : vector<1x128xf32> to vector<2x128xf32>
    %14 = arith.mulf %11, %13 : vector<2x128xf32>
    %cst_13 = arith.constant dense<0.000000e+00> : vector<2xf32>
    %15 = vector.multi_reduction <add>, %14, %cst_13 [1] : vector<2x128xf32> to vector<2xf32>
    %16 = vector.shape_cast %15 : vector<2xf32> to vector<2x1xf32>
    %c0_14 = arith.constant 0 : index
    %17 = memref.load %arg7[%c0_14] : memref<1xf32, #tpu.memory_space<smem>>
    %18 = vector.broadcast %17 : f32 to vector<2x1xf32>
    %19 = arith.addf %16, %18 : vector<2x1xf32>
    %20 = tpu.transpose %19, [1, 0] : vector<2x1xf32> -> vector<1x2xf32>
    %c0_15 = arith.constant 0 : index
    %c0_16 = arith.constant 0 : index
    %21 = vector.load %arg8[%c0_15, %c0_16] : memref<1x2xf32, #tpu.memory_space<vmem>>, vector<1x2xf32>
    tpu.vector_store %arg8[%c0_15, %c0_16], %20 {strides = array<i32>} : memref<1x2xf32, #tpu.memory_space<vmem>>, vector<1x2xf32>,
    return
  }
  func.func @transform_0(%arg0: i32) -> (i32, i32) {
    %c0_i32 = arith.constant 0 : i32
    %c0_i32_0 = arith.constant 0 : i32
    return %arg0, %c0_i32 : i32, i32
  }
  func.func @transform_1(%arg0: i32) -> (i32, i32) {
    %c0_i32 = arith.constant 0 : i32
    %c0_i32_0 = arith.constant 0 : i32
    return %arg0, %c0_i32 : i32, i32
  }
  func.func @transform_2(%arg0: i32) -> (i32, i32) {
    %c0_i32 = arith.constant 0 : i32
    %c0_i32_0 = arith.constant 0 : i32
    %c0_i32_1 = arith.constant 0 : i32
    return %c0_i32, %c0_i32_0 : i32, i32
  }
  func.func @transform_3(%arg0: i32) -> (i32, i32) {
    %c0_i32 = arith.constant 0 : i32
    %c0_i32_0 = arith.constant 0 : i32
    %c0_i32_1 = arith.constant 0 : i32
    return %c0_i32, %c0_i32_0 : i32, i32
  }
  func.func @transform_4(%arg0: i32) -> (i32, i32) {
    %c0_i32 = arith.constant 0 : i32
    %c0_i32_0 = arith.constant 0 : i32
    %c0_i32_1 = arith.constant 0 : i32
    return %c0_i32, %c0_i32_0 : i32, i32
  }
  func.func @transform_5(%arg0: i32) -> (i32, i32) {
    %c0_i32 = arith.constant 0 : i32
    %c0_i32_0 = arith.constant 0 : i32
    %c0_i32_1 = arith.constant 0 : i32
    return %c0_i32, %c0_i32_0 : i32, i32
  }
  func.func @transform_6(%arg0: i32) -> i32 {
    %c0_i32 = arith.constant 0 : i32
    %c0_i32_0 = arith.constant 0 : i32
    return %c0_i32 : i32
  }
  func.func @transform_7(%arg0: i32) -> (i32, i32) {
    %c0_i32 = arith.constant 0 : i32
    %c0_i32_0 = arith.constant 0 : i32
    return %c0_i32, %arg0 : i32, i32
  }
}

module attributes {stable_mosaic.version = 11 : i64} {
  func.func @_disc_kernel(%arg0: i32, %arg1: memref<2x64xbf16, #tpu.memory_space<vmem>>, %arg2: memref<2x8xbf16, #tpu.memory_space<vmem>>, %arg3: memref<64x128xbf16, #tpu.memory_space<vmem>>, %arg4: memref<8x128xbf16, #tpu.memory_space<vmem>>, %arg5: memref<1x128xf32, #tpu.memory_space<vmem>>, %arg6: memref<1x128xf32, #tpu.memory_space<vmem>>, %arg7: memref<1xf32, #tpu.memory_space<smem>>, %arg8: memref<1x2xf32, #tpu.memory_space<vmem>>) attributes {dimension_semantics = [#tpu.dimension_semantics<parallel>], iteration_bounds = array<i64: 1>, scalar_prefetch = 0 : i64, scratch_operands = 0 : i64, tpu.core_type = #tpu.core_type<tc>, window_params = [{transform_indices = @transform_0, window_bounds = array<i64: 2, 64>}, {transform_indices = @transform_1, window_bounds = array<i64: 2, 8>}, {pipeline_mode = #tpu.pipeline_mode<synchronous>, transform_indices = @transform_2, window_bounds = array<i64: 64, 128>}, {pipeline_mode = #tpu.pipeline_mode<synchronous>, transform_indices = @transform_3, window_bounds = array<i64: 8, 128>}, {pipeline_mode = #tpu.pipeline_mode<synchronous>, transform_indices = @transform_4, window_bounds = array<i64: 1, 128>}, {pipeline_mode = #tpu.pipeline_mode<synchronous>, transform_indices = @transform_5, window_bounds = array<i64: 1, 128>}, {transform_indices = @transform_6, window_bounds = array<i64: 1>}, {transform_indices = @transform_7, window_bounds = array<i64: 1, 2>}]} {
    %c0 = arith.constant 0 : index
    %c0_0 = arith.constant 0 : index
    %0 = vector.load %arg1[%c0, %c0_0] : memref<2x64xbf16, #tpu.memory_space<vmem>>, vector<2x64xbf16>
    %c0_1 = arith.constant 0 : index
    %c0_2 = arith.constant 0 : index
    %1 = vector.load %arg2[%c0_1, %c0_2] : memref<2x8xbf16, #tpu.memory_space<vmem>>, vector<2x8xbf16>
    %c0_3 = arith.constant 0 : index
    %c0_4 = arith.constant 0 : index
    %2 = vector.load %arg3[%c0_3, %c0_4] : memref<64x128xbf16, #tpu.memory_space<vmem>>, vector<64x128xbf16>
    %cst = arith.constant dense<0.000000e+00> : vector<2x128xf32>
    %3 = tpu.matmul %0, %2, %cst {dimension_numbers = #tpu.dot_dimension_numbers<[1], [0], [0], [1], [0, 0, 1, 1], [], []>} : vector<2x64xbf16>, vector<64x128xbf16>, vector<2x128xf32> -> vector<2x128xf32>
    %c0_5 = arith.constant 0 : index
    %c0_6 = arith.constant 0 : index
    %4 = vector.load %arg4[%c0_5, %c0_6] : memref<8x128xbf16, #tpu.memory_space<vmem>>, vector<8x128xbf16>
    %cst_7 = arith.constant dense<0.000000e+00> : vector<2x128xf32>
    %5 = tpu.matmul %1, %4, %cst_7 {dimension_numbers = #tpu.dot_dimension_numbers<[1], [0], [0], [1], [0, 0, 1, 1], [], []>} : vector<2x8xbf16>, vector<8x128xbf16>, vector<2x128xf32> -> vector<2x128xf32>
    %6 = arith.addf %3, %5 : vector<2x128xf32>
    %c0_8 = arith.constant 0 : index
    %c0_9 = arith.constant 0 : index
    %7 = vector.load %arg5[%c0_8, %c0_9] : memref<1x128xf32, #tpu.memory_space<vmem>>, vector<1x128xf32>
    %8 = vector.broadcast %7 : vector<1x128xf32> to vector<2x128xf32>
    %9 = arith.addf %6, %8 : vector<2x128xf32>
    %cst_10 = arith.constant 0.000000e+00 : f32
    %10 = vector.broadcast %cst_10 : f32 to vector<2x128xf32>
    %11 = arith.maximumf %9, %10 : vector<2x128xf32>
    %c0_11 = arith.constant 0 : index
    %c0_12 = arith.constant 0 : index
    %12 = vector.load %arg6[%c0_11, %c0_12] : memref<1x128xf32, #tpu.memory_space<vmem>>, vector<1x128xf32>
    %13 = vector.broadcast %12 : vector<1x128xf32> to vector<2x128xf32>
    %14 = arith.mulf %11, %13 : vector<2x128xf32>
    %cst_13 = arith.constant dense<0.000000e+00> : vector<2xf32>
    %15 = vector.multi_reduction <add>, %14, %cst_13 [1] : vector<2x128xf32> to vector<2xf32>
    %16 = vector.shape_cast %15 : vector<2xf32> to vector<2x1xf32>
    %c0_14 = arith.constant 0 : index
    %17 = memref.load %arg7[%c0_14] : memref<1xf32, #tpu.memory_space<smem>>
    %18 = vector.broadcast %17 : f32 to vector<2x1xf32>
    %19 = arith.addf %16, %18 : vector<2x1xf32>
    %20 = tpu.transpose %19, [1, 0] : vector<2x1xf32> -> vector<1x2xf32>
    %c0_15 = arith.constant 0 : index
    %c0_16 = arith.constant 0 : index
    %21 = vector.load %arg8[%c0_15, %c0_16] : memref<1x2xf32, #tpu.memory_space<vmem>>, vector<1x2xf32>
    tpu.vector_store %arg8[%c0_15, %c0_16], %20 {strides = array<i32>} : memref<1x2xf32, #tpu.memory_space<vmem>>, vector<1x2xf32>,
    return
  }
  func.func @transform_0(%arg0: i32) -> (i32, i32) {
    %c0_i32 = arith.constant 0 : i32
    %c0_i32_0 = arith.constant 0 : i32
    return %arg0, %c0_i32 : i32, i32
  }
  func.func @transform_1(%arg0: i32) -> (i32, i32) {
    %c0_i32 = arith.constant 0 : i32
    %c0_i32_0 = arith.constant 0 : i32
    return %arg0, %c0_i32 : i32, i32
  }
  func.func @transform_2(%arg0: i32) -> (i32, i32) {
    %c0_i32 = arith.constant 0 : i32
    %c0_i32_0 = arith.constant 0 : i32
    %c0_i32_1 = arith.constant 0 : i32
    return %c0_i32, %c0_i32_0 : i32, i32
  }
  func.func @transform_3(%arg0: i32) -> (i32, i32) {
    %c0_i32 = arith.constant 0 : i32
    %c0_i32_0 = arith.constant 0 : i32
    %c0_i32_1 = arith.constant 0 : i32
    return %c0_i32, %c0_i32_0 : i32, i32
  }
  func.func @transform_4(%arg0: i32) -> (i32, i32) {
    %c0_i32 = arith.constant 0 : i32
    %c0_i32_0 = arith.constant 0 : i32
    %c0_i32_1 = arith.constant 0 : i32
    return %c0_i32, %c0_i32_0 : i32, i32
  }
  func.func @transform_5(%arg0: i32) -> (i32, i32) {
    %c0_i32 = arith.constant 0 : i32
    %c0_i32_0 = arith.constant 0 : i32
    %c0_i32_1 = arith.constant 0 : i32
    return %c0_i32, %c0_i32_0 : i32, i32
  }
  func.func @transform_6(%arg0: i32) -> i32 {
    %c0_i32 = arith.constant 0 : i32
    %c0_i32_0 = arith.constant 0 : i32
    return %c0_i32 : i32
  }
  func.func @transform_7(%arg0: i32) -> (i32, i32) {
    %c0_i32 = arith.constant 0 : i32
    %c0_i32_0 = arith.constant 0 : i32
    return %c0_i32, %arg0 : i32, i32
  }
}

</mosaic_0001>

<bundles_post_ra>
// kernel: tpu_custom_call.1
= control target key start
LH: loop header
LB: loop body
LE: loop exit
PB: predicated region body
PF: predicated region fallthrough
CT: control target
= control target key end

     0   :  { %13 = vsyncpa [#allocation4], 0  ;;  %s418_s0 = inlined_call_operand.hbm [shape: bf16[2,64], index: 0, kind: input, shape index: {}]   ;;  %s419_s1 = inlined_call_operand.hbm [shape: bf16[2,8], index: 1, kind: input, shape index: {}]   ;;  %s420_s2 = inlined_call_operand.hbm [shape: bf16[64,128], index: 2, kind: input, shape index: {}]   ;;  %s421_s3 = inlined_call_operand.vmem [shape: bf16[8,128], index: 3, kind: input, shape index: {}]   ;;  %s422_s4 = inlined_call_operand.vmem [shape: f32[1,128], index: 4, kind: input, shape index: {}]   ;;  %s423_s5 = inlined_call_operand.vmem [shape: f32[1,128], index: 5, kind: input, shape index: {}]   ;;  %s424_s6 = inlined_call_operand.<no memory space> [shape: f32[1], index: 6, kind: input, shape index: {}]   ;;  %s425_s7 = inlined_call_operand.hbm [shape: f32[1,2], index: 7, kind: output, shape index: {}]  }
   0x1   :  { %14 = vsyncpa [#allocation7], 0  ;;  %s32_s26 = sshll.u32 %s419_s1, 4  ;;  %s33_s26 = int_to_ptr.hbm [resolvable:$true] %s32_s26 }
   0x2   :  { %15 = vsyncpa [#allocation5], 0  ;;  %s348_s27 = smov [#allocation6]   ;;  %s21_s8 = sshll.u32 %s418_s0, 4  ;;  %s22_s8 = int_to_ptr.hbm [resolvable:$true] %s21_s8 }
   0x3   :  { %s34_s28 = sshll.u32 %s348_s27, 4  ;;  %s349_s9 = smov [#allocation3]   ;;  %s35_s28 = int_to_ptr.vmem [resolvable:$true] %s34_s28 }
   0x4   :  { %37 = dma.hbm_to_vmem [thread:$0]  %s33_s26, 16, %s35_s28, [#allocation7]  }
   0x5   :  { %s23_s10 = sshll.u32 %s349_s9, 4  ;;  %s42_s13 = sshll.u32 %s420_s2, 4  ;;  %s24_s10 = int_to_ptr.vmem [resolvable:$true] %s23_s10  ;;  %s43_s13 = int_to_ptr.hbm [resolvable:$true] %s42_s13 }
   0x6   :  { %26 = dma.hbm_to_vmem [thread:$0]  %s22_s8, 16, %s24_s10, [#allocation4]  }
   0x7   :  { %s350_s1 = smov [#allocation8]   ;;  %s351_s15 = smov 64  }
   0x8   :  { %s44_s14 = sshll.u32 %s350_s1, 4  ;;  %s352_s16 = smov 4   ;;  %s45_s14 = int_to_ptr.vmem [resolvable:$true] %s44_s14 }
   0x9   :  { %50 = dma.hbm_to_vmem [thread:$0]  %s43_s13, 512, %s45_s14, [#allocation7], %s351_s15, %s351_s15, %s352_s16  }
   0xa   :  { %342 = dma.done.wait [#allocation4], 16  }
   0xb   :  { %343 = vsyncadd [#allocation4], 4294967280 }
   0xc   :  { %344 = dma.done.wait [#allocation7], 528  }
   0xd   :  { %345 = vsyncadd [#allocation7], 4294966768  ;;  %vm87_vm0 = vcmask 1043456   ;;  %v236_v0 = vld [vmem:[#allocation8 + $0x18] sm:$0xff]  ;;  %v235_v3 = vld [vmem:[#allocation8 + $0x10] sm:$0xff]  ;;  %vm83_vm1 = vcmask 64512   ;;  %v161_v19 = vstv %s424_s6 }
   0xe   :  { %v82_v1 = vld [vmem:[%s421_s3] sm:$0xf]  ;;  %136 = vmatpush.bf16.msra.mxu1 %v236_v0  ;;  %v234_v5 = vld [vmem:[#allocation8 + $0x8] sm:$0xff]  ;;  %v233_v6 = vld [vmem:[#allocation8] sm:$0xff]  ;;  %vm128_vm2 = vcmask 523264   ;;  %vm156_vm3 = vcmask 1041408  }
   0xf   :  { %v89_v2 = vsel %vm87_vm0, %v82_v1, 0  ;;  %v73_v4 = vld [vmem:[#allocation6] sm:$0x1]  ;;  %v72_v7 = vld [vmem:[#allocation3] sm:$0x1]  ;;  %s204_s25 = sshll.u32 %s425_s7, 4  ;;  %s205_s25 = int_to_ptr.hbm [resolvable:$true] %s204_s25 }
  0x10   :  { %98 = vmatpush.bf16.msra.mxu0 %v89_v2  ;;  %v244_v10 = vld [vmem:[%s422_s4] ss:$0 sm:$0xff]  ;;  %s353_s4 = smov [#allocation9]   ;;  %vm195_vm4 = vcmask 8192  }
  0x11   :  { %v245_v14 = vld [vmem:[%s423_s5] ss:$0 sm:$0xff]  ;;  %s202_s22 = sshll.u32 %s353_s4, 4  ;;  %s203_s22 = int_to_ptr.vmem [resolvable:$true] %s202_s22 }
  0x12   :  { %137 = vmatpush.bf16.msra.mxu1 %v235_v3 }
  0x13   :  { %215 = vmatmul.msk.bf16.vlgmr.msra.gmra.mxu0 %vm83_vm1, %v73_v4 }
  0x16   :  { %138 = vmatpush.bf16.msra.mxu1 %v234_v5 }
  0x1a   :  { %139 = vmatpush.bf16.msra.mxu1 %v233_v6 }
  0x1d   :  { %232 = vmatmul.msk.bf16.vlgmr.msra.gmra.mxu1 %vm128_vm2, %v72_v7 }
  0x90   :  { %v100_v8 = vpop.f32.mrf.mxu0 }
  0x98   :  { %v102_v9 = vpop.f32.mrf.mxu0 }
  0x9a   :  { %v141_v11 = vpop.f32.mrf.mxu1 }
  0x9b   :  { %v142_v12 = vadd.f32 %v141_v11, %v100_v8 }
  0x9d   :  { %v149_v13 = vadd.f32 %v244_v10, %v142_v12 }
  0x9f   :  { %v150_v15 = vmax.f32 %v149_v13, 0.0 }
  0xa1   :  { %v155_v16 = vmul.f32 %v245_v14, %v150_v15 }
  0xa2   :  { %v143_v17 = vpop.f32.mrf.mxu1 }
  0xa3   :  { %v157_v18 = vsel %vm156_vm3, %v155_v16, 0.0 }
  0xa4   :  { %158 = vadd.xlane.f32.xlu0 %v157_v18 }
 0x117   :  { %v159_v20 = vpop.xlane.xlu0 %158 }
 0x118   :  { %v162_v21 = vadd.f32 %v161_v19, %v159_v20 }
 0x11a   :  { %163 = vxpose.xlu0.b32.start.end [1/1] (short) (narrow) %v162_v21, 8 }
 0x1be   :  { %v179_v22 = vpop.trf.xlu0 }
 0x1bf   :  { %196 = vst.msk [vmem:[#allocation9] sm:$0x1] %vm195_vm4, %v179_v22 }
 0x1c0   :  { %207 = dma.vmem_to_hbm [thread:$0]  %s203_s22, 16, %s205_s25, [#allocation5]  }
 0x1c1   :  { %346 = dma.done.wait [#allocation5], 16  }
 0x1c2   :  { %347 = vsyncadd [#allocation5], 4294967280 }
 0x1c3   :  { %212 = vsyncpa [#allocation4], 1 }
 0x1c4   :  { %213 = vsyncpa [#allocation7], 1 }
 0x1c5   :  { %214 = vsyncpa [#allocation5], 1 }

// kernel: tpu_custom_call.1
= control target key start
LH: loop header
LB: loop body
LE: loop exit
PB: predicated region body
PF: predicated region fallthrough
CT: control target
= control target key end

     0   :  { %13 = vsyncpa [#allocation4], 0  ;;  %s418_s0 = inlined_call_operand.hbm [shape: bf16[2,64], index: 0, kind: input, shape index: {}]   ;;  %s419_s1 = inlined_call_operand.hbm [shape: bf16[2,8], index: 1, kind: input, shape index: {}]   ;;  %s420_s2 = inlined_call_operand.hbm [shape: bf16[64,128], index: 2, kind: input, shape index: {}]   ;;  %s421_s3 = inlined_call_operand.vmem [shape: bf16[8,128], index: 3, kind: input, shape index: {}]   ;;  %s422_s4 = inlined_call_operand.vmem [shape: f32[1,128], index: 4, kind: input, shape index: {}]   ;;  %s423_s5 = inlined_call_operand.vmem [shape: f32[1,128], index: 5, kind: input, shape index: {}]   ;;  %s424_s6 = inlined_call_operand.<no memory space> [shape: f32[1], index: 6, kind: input, shape index: {}]   ;;  %s425_s7 = inlined_call_operand.hbm [shape: f32[1,2], index: 7, kind: output, shape index: {}]  }
   0x1   :  { %14 = vsyncpa [#allocation7], 0  ;;  %s32_s26 = sshll.u32 %s419_s1, 4  ;;  %s33_s26 = int_to_ptr.hbm [resolvable:$true] %s32_s26 }
   0x2   :  { %15 = vsyncpa [#allocation5], 0  ;;  %s348_s27 = smov [#allocation6]   ;;  %s21_s8 = sshll.u32 %s418_s0, 4  ;;  %s22_s8 = int_to_ptr.hbm [resolvable:$true] %s21_s8 }
   0x3   :  { %s34_s28 = sshll.u32 %s348_s27, 4  ;;  %s349_s9 = smov [#allocation3]   ;;  %s35_s28 = int_to_ptr.vmem [resolvable:$true] %s34_s28 }
   0x4   :  { %37 = dma.hbm_to_vmem [thread:$0]  %s33_s26, 16, %s35_s28, [#allocation7]  }
   0x5   :  { %s23_s10 = sshll.u32 %s349_s9, 4  ;;  %s42_s13 = sshll.u32 %s420_s2, 4  ;;  %s24_s10 = int_to_ptr.vmem [resolvable:$true] %s23_s10  ;;  %s43_s13 = int_to_ptr.hbm [resolvable:$true] %s42_s13 }
   0x6   :  { %26 = dma.hbm_to_vmem [thread:$0]  %s22_s8, 16, %s24_s10, [#allocation4]  }
   0x7   :  { %s350_s1 = smov [#allocation8]   ;;  %s351_s15 = smov 64  }
   0x8   :  { %s44_s14 = sshll.u32 %s350_s1, 4  ;;  %s352_s16 = smov 4   ;;  %s45_s14 = int_to_ptr.vmem [resolvable:$true] %s44_s14 }
   0x9   :  { %50 = dma.hbm_to_vmem [thread:$0]  %s43_s13, 512, %s45_s14, [#allocation7], %s351_s15, %s351_s15, %s352_s16  }
   0xa   :  { %342 = dma.done.wait [#allocation4], 16  }
   0xb   :  { %343 = vsyncadd [#allocation4], 4294967280 }
   0xc   :  { %344 = dma.done.wait [#allocation7], 528  }
   0xd   :  { %345 = vsyncadd [#allocation7], 4294966768  ;;  %vm87_vm0 = vcmask 1043456   ;;  %v236_v0 = vld [vmem:[#allocation8 + $0x18] sm:$0xff]  ;;  %v235_v3 = vld [vmem:[#allocation8 + $0x10] sm:$0xff]  ;;  %vm83_vm1 = vcmask 64512   ;;  %v161_v19 = vstv %s424_s6 }
   0xe   :  { %v82_v1 = vld [vmem:[%s421_s3] sm:$0xf]  ;;  %136 = vmatpush.bf16.msra.mxu1 %v236_v0  ;;  %v234_v5 = vld [vmem:[#allocation8 + $0x8] sm:$0xff]  ;;  %v233_v6 = vld [vmem:[#allocation8] sm:$0xff]  ;;  %vm128_vm2 = vcmask 523264   ;;  %vm156_vm3 = vcmask 1041408  }
   0xf   :  { %v89_v2 = vsel %vm87_vm0, %v82_v1, 0  ;;  %v73_v4 = vld [vmem:[#allocation6] sm:$0x1]  ;;  %v72_v7 = vld [vmem:[#allocation3] sm:$0x1]  ;;  %s204_s25 = sshll.u32 %s425_s7, 4  ;;  %s205_s25 = int_to_ptr.hbm [resolvable:$true] %s204_s25 }
  0x10   :  { %98 = vmatpush.bf16.msra.mxu0 %v89_v2  ;;  %v244_v10 = vld [vmem:[%s422_s4] ss:$0 sm:$0xff]  ;;  %s353_s4 = smov [#allocation9]   ;;  %vm195_vm4 = vcmask 8192  }
  0x11   :  { %v245_v14 = vld [vmem:[%s423_s5] ss:$0 sm:$0xff]  ;;  %s202_s22 = sshll.u32 %s353_s4, 4  ;;  %s203_s22 = int_to_ptr.vmem [resolvable:$true] %s202_s22 }
  0x12   :  { %137 = vmatpush.bf16.msra.mxu1 %v235_v3 }
  0x13   :  { %215 = vmatmul.msk.bf16.vlgmr.msra.gmra.mxu0 %vm83_vm1, %v73_v4 }
  0x16   :  { %138 = vmatpush.bf16.msra.mxu1 %v234_v5 }
  0x1a   :  { %139 = vmatpush.bf16.msra.mxu1 %v233_v6 }
  0x1d   :  { %232 = vmatmul.msk.bf16.vlgmr.msra.gmra.mxu1 %vm128_vm2, %v72_v7 }
  0x90   :  { %v100_v8 = vpop.f32.mrf.mxu0 }
  0x98   :  { %v102_v9 = vpop.f32.mrf.mxu0 }
  0x9a   :  { %v141_v11 = vpop.f32.mrf.mxu1 }
  0x9b   :  { %v142_v12 = vadd.f32 %v141_v11, %v100_v8 }
  0x9d   :  { %v149_v13 = vadd.f32 %v244_v10, %v142_v12 }
  0x9f   :  { %v150_v15 = vmax.f32 %v149_v13, 0.0 }
  0xa1   :  { %v155_v16 = vmul.f32 %v245_v14, %v150_v15 }
  0xa2   :  { %v143_v17 = vpop.f32.mrf.mxu1 }
  0xa3   :  { %v157_v18 = vsel %vm156_vm3, %v155_v16, 0.0 }
  0xa4   :  { %158 = vadd.xlane.f32.xlu0 %v157_v18 }
 0x117   :  { %v159_v20 = vpop.xlane.xlu0 %158 }
 0x118   :  { %v162_v21 = vadd.f32 %v161_v19, %v159_v20 }
 0x11a   :  { %163 = vxpose.xlu0.b32.start.end [1/1] (short) (narrow) %v162_v21, 8 }
 0x1be   :  { %v179_v22 = vpop.trf.xlu0 }
 0x1bf   :  { %196 = vst.msk [vmem:[#allocation9] sm:$0x1] %vm195_vm4, %v179_v22 }
 0x1c0   :  { %207 = dma.vmem_to_hbm [thread:$0]  %s203_s22, 16, %s205_s25, [#allocation5]  }
 0x1c1   :  { %346 = dma.done.wait [#allocation5], 16  }
 0x1c2   :  { %347 = vsyncadd [#allocation5], 4294967280 }
 0x1c3   :  { %212 = vsyncpa [#allocation4], 1 }
 0x1c4   :  { %213 = vsyncpa [#allocation7], 1 }
 0x1c5   :  { %214 = vsyncpa [#allocation5], 1 }

</bundles_post_ra>
